<compile_context>
chip_gen: v7x
topology: tpu7x:2x2x1
jax: 0.10.0
libtpu: 0.0.40
codegen_flags: <defaults>
</compile_context>

<pallas_src>
import jax
import jax.numpy as jnp
from jax.experimental import pallas as pl
from jax.experimental.pallas import tpu as pltpu


def tms_kernel(x_ref, w_ref, b_ref, o_ref):
    # x_ref: (F, B, I)  per-feature slabs of the input
    # w_ref: (H, F, I)  W transposed so each (h, f) row is an (I,)-vector
    # b_ref: (1, F*I)   b_final in merged (f, i) lane order
    # o_ref: (B, F*I)   lane-dense output slab, written with a single store
    n_feat = x_ref.shape[0]
    n_hidden = w_ref.shape[0]

    xs = [x_ref[f] for f in range(n_feat)]       # each (B, I)
    ws = [w_ref[h] for h in range(n_hidden)]     # each (F, I)

    # hidden[b, i, h] = sum_f x[b, i, f] * W[i, h, f]
    # Fully unrolled VPU multiply-adds: no XLU reduce, no 4-D temporaries.
    hidden = []
    for h in range(n_hidden):
        acc = xs[0] * ws[h][0:1, :]
        for f in range(1, n_feat):
            acc = acc + xs[f] * ws[h][f:f + 1, :]
        hidden.append(acc)                       # (B, I)

    # out[b, i, f] = sum_h hidden[b, i, h] * W[i, h, f]  (unrolled over H)
    outs = []
    for f in range(n_feat):
        acc = hidden[0] * ws[0][f:f + 1, :]
        for h in range(1, n_hidden):
            acc = acc + hidden[h] * ws[h][f:f + 1, :]
        outs.append(acc)                         # (B, I)

    # One lane-dense (B, F*I) slab: bias add + ReLU + single store.
    out = jnp.concatenate(outs, axis=-1)         # (B, F*I)
    o_ref[...] = jnp.maximum(out + b_ref[...], 0.0).astype(o_ref.dtype)


def tms_forward(features, W, b_final):
    """features: (batch, n_instances, n_features)  [PyTorch convention]
       W:        (n_instances, n_hidden, n_features)
       b_final:  (n_instances, n_features)
       returns:  (batch, n_instances, n_features)
    """
    batch, n_inst, n_feat = features.shape
    _, n_hidden, _ = W.shape

    # Layout plumbing (outside the kernel): f-major input slabs and a merged
    # (f, i) lane order for bias / output.
    x_t = jnp.transpose(features, (2, 0, 1))                     # (F, B, I)
    w_t = jnp.transpose(W, (1, 2, 0))                            # (H, F, I)
    b_t = jnp.transpose(b_final, (1, 0)).reshape(1, n_feat * n_inst)  # (1, F*I)

    out_flat = pl.pallas_call(
        tms_kernel,
        out_shape=jax.ShapeDtypeStruct((batch, n_feat * n_inst), features.dtype),
        in_specs=[
            pl.BlockSpec(memory_space=pltpu.MemorySpace.VMEM),   # x_t (whole array)
            pl.BlockSpec(memory_space=pltpu.MemorySpace.VMEM),   # w_t (whole array)
            pl.BlockSpec(memory_space=pltpu.MemorySpace.VMEM),   # b_t
        ],
        out_specs=pl.BlockSpec(memory_space=pltpu.MemorySpace.VMEM),
    )(x_t, w_t, b_t)

    # (B, F*I) -> (B, F, I) -> (B, I, F)
    return jnp.transpose(out_flat.reshape(batch, n_feat, n_inst), (0, 2, 1))


def reference_forward(features, W, b_final):
    hidden = jnp.einsum("bif,ihf->bih", features, W)
    out = jnp.einsum("bih,ihf->bif", hidden, W)
    return jax.nn.relu(out + b_final[None])


if __name__ == "__main__":
    # Config: n_instances=8, n_hidden=2, groups=[2, 2] -> n_features = 4
    n_instances = 8
    n_hidden = 2
    n_features = 4
    batch = 8

    key = jax.random.PRNGKey(0)
    k_w, k_x = jax.random.split(key)

    # Deterministic xavier-normal-style init for W (exact stats do not affect
    # the correctness check below).
    fan_in = n_hidden * n_features
    fan_out = n_instances * n_features
    std = (2.0 / (fan_in + fan_out)) ** 0.5
    W = std * jax.random.normal(
        k_w, (n_instances, n_hidden, n_features), dtype=jnp.float32
    )
    b_final = jnp.zeros((n_instances, n_features), dtype=jnp.float32)

    # Synthetic input batch (PyTorch convention: batch, instances, features).
    features = jax.random.uniform(
        k_x, (batch, n_instances, n_features), dtype=jnp.float32
    )

    y = tms_forward(features, W, b_final)
    y = jax.block_until_ready(y)

    y_ref = reference_forward(features, W, b_final)
    assert y.shape == (batch, n_instances, n_features)
    assert jnp.allclose(y, y_ref, atol=1e-5, rtol=1e-5)

    print("KERNEL_OK")
</pallas_src>

<mosaic_0001>
module attributes {stable_mosaic.version = 11 : i64} {
  func.func @tms_kernel(%arg0: memref<4x8x8xf32, #tpu.memory_space<vmem>>, %arg1: memref<2x4x8xf32, #tpu.memory_space<vmem>>, %arg2: memref<1x32xf32, #tpu.memory_space<vmem>>, %arg3: memref<8x32xf32, #tpu.memory_space<vmem>>) attributes {dimension_semantics = [], scalar_prefetch = 0 : i64, scratch_operands = 0 : i64, tpu.core_type = #tpu.core_type<tc>} {
    %c0 = arith.constant 0 : index
    %c0_0 = arith.constant 0 : index
    %c0_1 = arith.constant 0 : index
    %0 = vector.load %arg0[%c0, %c0_0, %c0_1] : memref<4x8x8xf32, #tpu.memory_space<vmem>>, vector<1x8x8xf32>
    %1 = vector.shape_cast %0 : vector<1x8x8xf32> to vector<8x8xf32>
    %c1 = arith.constant 1 : index
    %c0_2 = arith.constant 0 : index
    %c0_3 = arith.constant 0 : index
    %2 = vector.load %arg0[%c1, %c0_2, %c0_3] : memref<4x8x8xf32, #tpu.memory_space<vmem>>, vector<1x8x8xf32>
    %3 = vector.shape_cast %2 : vector<1x8x8xf32> to vector<8x8xf32>
    %c2 = arith.constant 2 : index
    %c0_4 = arith.constant 0 : index
    %c0_5 = arith.constant 0 : index
    %4 = vector.load %arg0[%c2, %c0_4, %c0_5] : memref<4x8x8xf32, #tpu.memory_space<vmem>>, vector<1x8x8xf32>
    %5 = vector.shape_cast %4 : vector<1x8x8xf32> to vector<8x8xf32>
    %c3 = arith.constant 3 : index
    %c0_6 = arith.constant 0 : index
    %c0_7 = arith.constant 0 : index
    %6 = vector.load %arg0[%c3, %c0_6, %c0_7] : memref<4x8x8xf32, #tpu.memory_space<vmem>>, vector<1x8x8xf32>
    %7 = vector.shape_cast %6 : vector<1x8x8xf32> to vector<8x8xf32>
    %c0_8 = arith.constant 0 : index
    %c0_9 = arith.constant 0 : index
    %c0_10 = arith.constant 0 : index
    %8 = vector.load %arg1[%c0_8, %c0_9, %c0_10] : memref<2x4x8xf32, #tpu.memory_space<vmem>>, vector<1x4x8xf32>
    %9 = vector.shape_cast %8 : vector<1x4x8xf32> to vector<4x8xf32>
    %c1_11 = arith.constant 1 : index
    %c0_12 = arith.constant 0 : index
    %c0_13 = arith.constant 0 : index
    %10 = vector.load %arg1[%c1_11, %c0_12, %c0_13] : memref<2x4x8xf32, #tpu.memory_space<vmem>>, vector<1x4x8xf32>
    %11 = vector.shape_cast %10 : vector<1x4x8xf32> to vector<4x8xf32>
    %12 = vector.extract_strided_slice %9 {offsets = [0, 0], sizes = [1, 8], strides = [1, 1]} : vector<4x8xf32> to vector<1x8xf32>
    %13 = vector.broadcast %12 : vector<1x8xf32> to vector<8x8xf32>
    %14 = arith.mulf %1, %13 : vector<8x8xf32>
    %15 = vector.extract_strided_slice %9 {offsets = [1, 0], sizes = [1, 8], strides = [1, 1]} : vector<4x8xf32> to vector<1x8xf32>
    %16 = vector.broadcast %15 : vector<1x8xf32> to vector<8x8xf32>
    %17 = arith.mulf %3, %16 : vector<8x8xf32>
    %18 = arith.addf %14, %17 : vector<8x8xf32>
    %19 = vector.extract_strided_slice %9 {offsets = [2, 0], sizes = [1, 8], strides = [1, 1]} : vector<4x8xf32> to vector<1x8xf32>
    %20 = vector.broadcast %19 : vector<1x8xf32> to vector<8x8xf32>
    %21 = arith.mulf %5, %20 : vector<8x8xf32>
    %22 = arith.addf %18, %21 : vector<8x8xf32>
    %23 = vector.extract_strided_slice %9 {offsets = [3, 0], sizes = [1, 8], strides = [1, 1]} : vector<4x8xf32> to vector<1x8xf32>
    %24 = vector.broadcast %23 : vector<1x8xf32> to vector<8x8xf32>
    %25 = arith.mulf %7, %24 : vector<8x8xf32>
    %26 = arith.addf %22, %25 : vector<8x8xf32>
    %27 = vector.extract_strided_slice %11 {offsets = [0, 0], sizes = [1, 8], strides = [1, 1]} : vector<4x8xf32> to vector<1x8xf32>
    %28 = vector.broadcast %27 : vector<1x8xf32> to vector<8x8xf32>
    %29 = arith.mulf %1, %28 : vector<8x8xf32>
    %30 = vector.extract_strided_slice %11 {offsets = [1, 0], sizes = [1, 8], strides = [1, 1]} : vector<4x8xf32> to vector<1x8xf32>
    %31 = vector.broadcast %30 : vector<1x8xf32> to vector<8x8xf32>
    %32 = arith.mulf %3, %31 : vector<8x8xf32>
    %33 = arith.addf %29, %32 : vector<8x8xf32>
    %34 = vector.extract_strided_slice %11 {offsets = [2, 0], sizes = [1, 8], strides = [1, 1]} : vector<4x8xf32> to vector<1x8xf32>
    %35 = vector.broadcast %34 : vector<1x8xf32> to vector<8x8xf32>
    %36 = arith.mulf %5, %35 : vector<8x8xf32>
    %37 = arith.addf %33, %36 : vector<8x8xf32>
    %38 = vector.extract_strided_slice %11 {offsets = [3, 0], sizes = [1, 8], strides = [1, 1]} : vector<4x8xf32> to vector<1x8xf32>
    %39 = vector.broadcast %38 : vector<1x8xf32> to vector<8x8xf32>
    %40 = arith.mulf %7, %39 : vector<8x8xf32>
    %41 = arith.addf %37, %40 : vector<8x8xf32>
    %42 = vector.extract_strided_slice %9 {offsets = [0, 0], sizes = [1, 8], strides = [1, 1]} : vector<4x8xf32> to vector<1x8xf32>
    %43 = vector.broadcast %42 : vector<1x8xf32> to vector<8x8xf32>
    %44 = arith.mulf %26, %43 : vector<8x8xf32>
    %45 = vector.extract_strided_slice %11 {offsets = [0, 0], sizes = [1, 8], strides = [1, 1]} : vector<4x8xf32> to vector<1x8xf32>
    %46 = vector.broadcast %45 : vector<1x8xf32> to vector<8x8xf32>
    %47 = arith.mulf %41, %46 : vector<8x8xf32>
    %48 = arith.addf %44, %47 : vector<8x8xf32>
    %49 = vector.extract_strided_slice %9 {offsets = [1, 0], sizes = [1, 8], strides = [1, 1]} : vector<4x8xf32> to vector<1x8xf32>
    %50 = vector.broadcast %49 : vector<1x8xf32> to vector<8x8xf32>
    %51 = arith.mulf %26, %50 : vector<8x8xf32>
    %52 = vector.extract_strided_slice %11 {offsets = [1, 0], sizes = [1, 8], strides = [1, 1]} : vector<4x8xf32> to vector<1x8xf32>
    %53 = vector.broadcast %52 : vector<1x8xf32> to vector<8x8xf32>
    %54 = arith.mulf %41, %53 : vector<8x8xf32>
    %55 = arith.addf %51, %54 : vector<8x8xf32>
    %56 = vector.extract_strided_slice %9 {offsets = [2, 0], sizes = [1, 8], strides = [1, 1]} : vector<4x8xf32> to vector<1x8xf32>
    %57 = vector.broadcast %56 : vector<1x8xf32> to vector<8x8xf32>
    %58 = arith.mulf %26, %57 : vector<8x8xf32>
    %59 = vector.extract_strided_slice %11 {offsets = [2, 0], sizes = [1, 8], strides = [1, 1]} : vector<4x8xf32> to vector<1x8xf32>
    %60 = vector.broadcast %59 : vector<1x8xf32> to vector<8x8xf32>
    %61 = arith.mulf %41, %60 : vector<8x8xf32>
    %62 = arith.addf %58, %61 : vector<8x8xf32>
    %63 = vector.extract_strided_slice %9 {offsets = [3, 0], sizes = [1, 8], strides = [1, 1]} : vector<4x8xf32> to vector<1x8xf32>
    %64 = vector.broadcast %63 : vector<1x8xf32> to vector<8x8xf32>
    %65 = arith.mulf %26, %64 : vector<8x8xf32>
    %66 = vector.extract_strided_slice %11 {offsets = [3, 0], sizes = [1, 8], strides = [1, 1]} : vector<4x8xf32> to vector<1x8xf32>
    %67 = vector.broadcast %66 : vector<1x8xf32> to vector<8x8xf32>
    %68 = arith.mulf %41, %67 : vector<8x8xf32>
    %69 = arith.addf %65, %68 : vector<8x8xf32>
    %70 = tpu.concatenate %48, %55, %62, %69 in 1 : vector<8x8xf32>, vector<8x8xf32>, vector<8x8xf32>, vector<8x8xf32> -> vector<8x32xf32>
    %c0_14 = arith.constant 0 : index
    %c0_15 = arith.constant 0 : index
    %71 = vector.load %arg2[%c0_14, %c0_15] : memref<1x32xf32, #tpu.memory_space<vmem>>, vector<1x32xf32>
    %72 = vector.broadcast %71 : vector<1x32xf32> to vector<8x32xf32>
    %73 = arith.addf %70, %72 : vector<8x32xf32>
    %cst = arith.constant 0.000000e+00 : f32
    %74 = vector.broadcast %cst : f32 to vector<8x32xf32>
    %75 = arith.maximumf %73, %74 : vector<8x32xf32>
    %c0_16 = arith.constant 0 : index
    %c0_17 = arith.constant 0 : index
    %76 = vector.load %arg3[%c0_16, %c0_17] : memref<8x32xf32, #tpu.memory_space<vmem>>, vector<8x32xf32>
    tpu.vector_store %arg3[%c0_16, %c0_17], %75 {strides = array<i32>} : memref<8x32xf32, #tpu.memory_space<vmem>>, vector<8x32xf32>,
    return
  }
}

</mosaic_0001>

<bundles_post_ra>
// kernel: tpu_custom_call.1
= control target key start
LH: loop header
LB: loop body
LE: loop exit
PB: predicated region body
PF: predicated region fallthrough
CT: control target
= control target key end

     0   :  { %8 = vsyncpa [#allocation3], 0  ;;  %s308_s0 = inlined_call_operand.hbm [shape: f32[4,8,8], index: 0, kind: input, shape index: {}]   ;;  %s309_s1 = inlined_call_operand.hbm [shape: f32[2,4,8], index: 1, kind: input, shape index: {}]   ;;  %s310_s2 = inlined_call_operand.vmem [shape: f32[1,32], index: 2, kind: input, shape index: {}]   ;;  %s311_s3 = inlined_call_operand.hbm [shape: f32[8,32], index: 3, kind: output, shape index: {}]  }
   0x1   :  { %9 = vsyncpa [#allocation6], 0 }
   0x2   :  { %10 = vsyncpa [#allocation4], 0  ;;  %s238_s12 = smov [#allocation2]   ;;  %s166_s16 = scalar_lea.hbm %s308_s0, 512 }
   0x3   :  { %s16_s13 = sshll.u32 %s238_s12, 4  ;;  %p167_p0 = scmp.ne.s32.totalorder %s308_s0, %s166_s16  ;;  %s17_s13 = int_to_ptr.vmem [resolvable:$true] %s16_s13 }
   0x4   :  { %p170_p1 = scmp.lt.u32.totalorder %s166_s16, %s308_s0 }
   0x6   :  { %p172_p2 = pnand %p170_p1, %p167_p0 }
   0x8   :  { %175 = shalt.err (!%p172_p2)
}
   0x9   :  { %s176_s21 = scalar_lea.vmem %s17_s13, 512  ;;  %p181_p4 = scmp.lt.s32.totalorder %s17_s13, %s17_s13 }
   0xa   :  { %p177_p3 = scmp.ne.s32.totalorder %s17_s13, %s176_s21  ;;  %p182_p5 = scmp.lt.s32.totalorder %s176_s21, %s176_s21 }
   0xc   :  { %p183_p6 = por %p182_p5, %p181_p4 }
   0xe   :  { %p184_p7 = pnand %p183_p6, %p177_p3 }
  0x10   :  { %187 = shalt.err (!%p184_p7)
}
  0x11   :  { %s239_s22 = smov 128   ;;  %s240_s23 = smov 8  }
  0x12   :  { %22 = dma.hbm_to_vmem [thread:$0]  %s308_s0, 512, %s17_s13, [#allocation3], %s239_s22, %s239_s22, %s240_s23  }
  0x13   :  { %s241_s26 = smov [#allocation5]   ;;  %s188_s30 = scalar_lea.hbm %s309_s1, 128 }
  0x14   :  { %s28_s27 = sshll.u32 %s241_s26, 4  ;;  %p189_p8 = scmp.ne.s32.totalorder %s309_s1, %s188_s30  ;;  %s29_s27 = int_to_ptr.vmem [resolvable:$true] %s28_s27 }
  0x15   :  { %p192_p9 = scmp.lt.u32.totalorder %s188_s30, %s309_s1 }
  0x17   :  { %p194_p10 = pnand %p192_p9, %p189_p8 }
  0x19   :  { %197 = shalt.err (!%p194_p10)
}
  0x1a   :  { %s198_s8 = scalar_lea.vmem %s29_s27, 128  ;;  %p203_p12 = scmp.lt.s32.totalorder %s29_s27, %s29_s27 }
  0x1b   :  { %p199_p11 = scmp.ne.s32.totalorder %s29_s27, %s198_s8  ;;  %p204_p13 = scmp.lt.s32.totalorder %s198_s8, %s198_s8 }
  0x1d   :  { %p205_p0 = por %p204_p13, %p203_p12 }
  0x1f   :  { %p206_p1 = pnand %p205_p0, %p199_p11 }
  0x21   :  { %209 = shalt.err (!%p206_p1)
}
  0x22   :  { %s242_s0 = smov 64   ;;  %s243_s9 = smov 4  }
  0x23   :  { %34 = dma.hbm_to_vmem [thread:$0]  %s309_s1, 128, %s29_s27, [#allocation6], %s242_s0, %s242_s0, %s243_s9  }
  0x24   :  { %232 = dma.done.wait [#allocation3], 512  }
  0x25   :  { %233 = vsyncadd [#allocation3], 4294966784 }
  0x26   :  { %234 = dma.done.wait [#allocation6], 128  }
  0x27   :  { %235 = vsyncadd [#allocation6], 4294967168  ;;  %v53_v0 = vlaneseq  ;;  %v43_v6 = vld [vmem:[#allocation2] sm:$0xff]  ;;  %v45_v7 = vld [vmem:[#allocation2 + $0x8] sm:$0xff]  ;;  %s244_s1 = smov 24   ;;  %s245_s12 = smov 16  }
  0x28   :  { %v47_v8 = vld [vmem:[#allocation2 + $0x10] sm:$0xff]  ;;  %v50_v9 = vld [vmem:[#allocation5] sm:$0xf]  ;;  %v52_v10 = vld [vmem:[#allocation5 + $0x4] sm:$0xf]  ;;  %vm123_vm0 = vcmask 64512  }
  0x29   :  { %v54_v1 = vshrl.u32 %v53_v0, 7  ;;  %v49_v15 = vld [vmem:[#allocation2 + $0x18] sm:$0xff]  ;;  %vm125_vm1 = vcmask 130048   ;;  %vm127_vm2 = vcmask 195584   ;;  %v156_v50 = vld [vmem:[%s310_s2] ss:$0 sm:$0xff] }
  0x2a   :  { %s246_s15 = smov [#allocation7]   ;;  %vm138_vm3 = vcmask 261120  }
  0x2b   :  { %v55_v2 = vsub.s32 0, %v54_v1  ;;  %v60_v3 = vsub.s32 1, %v54_v1  ;;  %v66_v4 = vsub.s32 2, %v54_v1  ;;  %v72_v5 = vsub.s32 3, %v54_v1  ;;  %s146_s16 = sshll.u32 %s246_s15, 4  ;;  %s147_s16 = int_to_ptr.vmem [resolvable:$true] %s146_s16 }
  0x2c   :  { %s210_s17 = scalar_lea.vmem %s147_s16, 128  ;;  %p215_p3 = scmp.lt.s32.totalorder %s147_s16, %s147_s16 }
  0x2d   :  { %v56_v11 = vrot.slane %v50_v9, %v55_v2  ;;  %v61_v12 = vrot.slane %v50_v9, %v60_v3  ;;  %v67_v13 = vrot.slane %v50_v9, %v66_v4  ;;  %v73_v14 = vrot.slane %v50_v9, %v72_v5  ;;  %p211_p2 = scmp.ne.s32.totalorder %s147_s16, %s210_s17  ;;  %p216_p4 = scmp.lt.s32.totalorder %s210_s17, %s210_s17 }
  0x2e   :  { %v79_v16 = vrot.slane %v52_v10, %v55_v2  ;;  %v84_v17 = vrot.slane %v52_v10, %v60_v3  ;;  %v90_v18 = vrot.slane %v52_v10, %v66_v4  ;;  %v96_v19 = vrot.slane %v52_v10, %v72_v5 }
  0x2f   :  { %v57_v20 = vmul.f32 %v56_v11, %v43_v6  ;;  %v62_v21 = vmul.f32 %v61_v12, %v45_v7  ;;  %v68_v22 = vmul.f32 %v67_v13, %v47_v8  ;;  %v74_v27 = vmul.f32 %v73_v14, %v49_v15  ;;  %p217_p5 = por %p216_p4, %p215_p3 }
  0x30   :  { %v80_v23 = vmul.f32 %v79_v16, %v43_v6  ;;  %v85_v24 = vmul.f32 %v84_v17, %v45_v7  ;;  %v91_v25 = vmul.f32 %v90_v18, %v47_v8  ;;  %v97_v29 = vmul.f32 %v96_v19, %v49_v15 }
  0x31   :  { %v63_v26 = vadd.f32 %v62_v21, %v57_v20  ;;  %p218_p6 = pnand %p217_p5, %p211_p2 }
  0x32   :  { %v86_v28 = vadd.f32 %v85_v24, %v80_v23 }
  0x33   :  { %v69_v30 = vadd.f32 %v68_v22, %v63_v26 }
  0x34   :  { %v92_v31 = vadd.f32 %v91_v25, %v86_v28 }
  0x35   :  { %v75_v32 = vadd.f32 %v74_v27, %v69_v30 }
  0x36   :  { %v98_v33 = vadd.f32 %v97_v29, %v92_v31 }
  0x37   :  { %v102_v34 = vmul.f32 %v75_v32, %v61_v12  ;;  %v105_v35 = vmul.f32 %v75_v32, %v67_v13  ;;  %v108_v36 = vmul.f32 %v75_v32, %v73_v14  ;;  %v99_v37 = vmul.f32 %v75_v32, %v56_v11 }
  0x38   :  { %v103_v38 = vmul.f32 %v98_v33, %v84_v17  ;;  %v106_v39 = vmul.f32 %v98_v33, %v90_v18  ;;  %v109_v40 = vmul.f32 %v98_v33, %v96_v19  ;;  %v100_v41 = vmul.f32 %v98_v33, %v79_v16 }
  0x3a   :  { %v104_v42 = vadd.f32 %v103_v38, %v102_v34  ;;  %v110_v43 = vadd.f32 %v109_v40, %v108_v36  ;;  %v101_v44 = vadd.f32 %v100_v41, %v99_v37  ;;  %v107_v45 = vadd.f32 %v106_v39, %v105_v35 }
  0x3c   :  { %112 = vrot.lane.b32.xlu0 %v104_v42, %s240_s23  ;;  %120 = vrot.lane.b32.xlu1 %v110_v43, %s244_s1 }
  0x40   :  { %116 = vrot.lane.b32.xlu0 %v107_v45, %s245_s12 }
  0xae   :  { %v113_v46 = vpop.permute.xlu0 %112  ;;  %v121_v47 = vpop.permute.xlu1 %120 }
  0xaf   :  { %v124_v48 = vsel %vm123_vm0, %v101_v44, %v113_v46 }
  0xb2   :  { %v117_v49 = vpop.permute.xlu0 %116 }
  0xb3   :  { %v126_v51 = vsel %vm125_vm1, %v124_v48, %v117_v49 }
  0xb4   :  { %v128_v52 = vsel %vm127_vm2, %v126_v51, %v121_v47 }
  0xb5   :  { %v136_v53 = vadd.f32 %v156_v50, %v128_v52 }
  0xb7   :  { %v137_v54 = vmax.f32 %v136_v53, 0.0 }
  0xb9   :  { %139 = vst.msk [vmem:[#allocation7] sm:$0xff] %vm138_vm3, %v137_v54 }
  0xba   :  { %221 = shalt.err (!%p218_p6)
}
  0xbb   :  { %s222_s2 = scalar_lea.hbm %s311_s3, 128 }
  0xbc   :  { %p223_p7 = scmp.ne.s32.totalorder %s311_s3, %s222_s2  ;;  %p226_p8 = scmp.lt.u32.totalorder %s222_s2, %s311_s3 }
  0xbe   :  { %p228_p9 = pnand %p226_p8, %p223_p7 }
  0xc0   :  { %231 = shalt.err (!%p228_p9)
}
  0xc1   :  { %149 = dma.vmem_to_hbm [thread:$0]  %s147_s16, 128, %s311_s3, [#allocation4]  }
  0xc2   :  { %236 = dma.done.wait [#allocation4], 128  }
  0xc3   :  { %237 = vsyncadd [#allocation4], 4294967168 }
  0xc4   :  { %153 = vsyncpa [#allocation3], 1 }
  0xc5   :  { %154 = vsyncpa [#allocation6], 1 }
  0xc6   :  { %155 = vsyncpa [#allocation4], 1 }

</bundles_post_ra>
